<compile_context>
chip_gen: v5e
topology: v5e:2x2
jax: 0.10.0
libtpu: 0.0.40
codegen_flags: <defaults>
</compile_context>

<pallas_src>
import jax
import jax.numpy as jnp
from jax.experimental import pallas as pl
from jax.experimental.pallas import tpu as pltpu


def _round_up(x, m):
    return (x + m - 1) // m * m


def dmso_kernel(ids1_ref, ids2_ref, emb_ref, w1_ref, w2_ref, out_ref):
    """Fused embed -> mean-pool -> compare-features -> 2-layer MLP.

    ids1_ref, ids2_ref : (TB, L)         int32 token ids (one batch tile)
    emb_ref            : (VP, D)         f32 embedding table, vocab padded to 128
    w1_ref             : (4*D + 1, HP)   f32, rows 0..4D-1 = W1, last row = b1
    w2_ref             : (HP + 1, CP)    f32, rows 0..HP-1 = W2 (zero rows for
                                         the H->HP pad), last row = b2
    out_ref            : (TB, CP)        f32 padded logits
    """
    VP, D = emb_ref.shape
    TB, L = ids1_ref.shape
    D4 = 4 * D
    HP = w2_ref.shape[0] - 1
    rows = 2 * TB

    # Both sequences stacked on the sublane axis -> one pooling pass and a
    # single (2TB, VP) @ (VP, D) MXU launch covers both sentence vectors.
    ids = jnp.concatenate([ids1_ref[...], ids2_ref[...]], axis=0)     # (2TB, L)

    # Vocab iota built ONCE and kept at a single vreg row; the compares below
    # broadcast it across sublanes (cheap) instead of materializing a
    # (rows, L, VP) iota.
    vocab_row = jax.lax.broadcasted_iota(jnp.int32, (1, VP), 1)       # (1, VP)

    # 2-D one-hot accumulation: counts[b, v] = #{l : ids[b, l] == v}.
    # Static lane slices + a tiny unrolled loop keep the live set to `counts`
    # plus one (rows, VP) temp -- no 3-D one-hot, no cross-sublane reduce.
    counts = jnp.zeros((rows, VP), jnp.float32)
    for l in range(L):                                # L is static & small
        col = ids[:, l:l + 1]                                         # (2TB, 1)
        counts = counts + (col == vocab_row).astype(jnp.float32)

    # Mean pool via counts @ emb (gather-free; ids outside [0, V) contribute 0).
    inv_len = jnp.float32(1.0 / L)
    pooled = jnp.dot(counts, emb_ref[...],
                     preferred_element_type=jnp.float32) * inv_len    # (2TB, D)
    v1 = pooled[:TB, :]
    v2 = pooled[TB:, :]

    # Comparison features packed into one lane-dense (TB, 4*D = 128) tile so
    # the first Linear is a single K=128 MXU pass.
    feat = jnp.concatenate([v1, v2, jnp.abs(v1 - v2), v1 * v2], axis=-1)

    # Layer 1 (bias folded into the last row of w1_ref; HP=256 lane-dense) + ReLU.
    h = (jnp.dot(feat, w1_ref[:D4, :], preferred_element_type=jnp.float32)
         + w1_ref[D4:, :])
    h = jnp.maximum(h, 0.0)
    # Dropout(p=0.2) is identity at inference time.

    # Layer 2 / classifier (bias folded; CP=128 lane-dense store; the wrapper
    # slices back to num_classes).
    out_ref[...] = (jnp.dot(h, w2_ref[:HP, :], preferred_element_type=jnp.float32)
                    + w2_ref[HP:, :])


def pack_params(params):
    """One-time packing: fold biases into weights, zero-pad to lane-dense shapes."""
    emb = params["embedding"].astype(jnp.float32)          # (V, D)
    w1 = params["w1"].astype(jnp.float32)                  # (4D, H)
    b1 = params["b1"].astype(jnp.float32)                  # (1, H)
    w2 = params["w2"].astype(jnp.float32)                  # (H, C)
    b2 = params["b2"].astype(jnp.float32)                  # (1, C)

    V, D = emb.shape
    H = w1.shape[1]
    C = w2.shape[1]
    VP = _round_up(V, 128)      # lane-dense counts tile / clean matmul K
    HP = _round_up(H, 128)      # 200 -> 256 lane-dense hidden
    CP = _round_up(C, 128)      # 4   -> 128 lane-dense output

    emb_p = jnp.pad(emb, ((0, VP - V), (0, 0)))                        # (VP, D)
    w1_aug = jnp.concatenate([w1, b1], axis=0)                         # (4D+1, H)
    w1_aug = jnp.pad(w1_aug, ((0, 0), (0, HP - H)))                    # (4D+1, HP)
    w2_p = jnp.pad(w2, ((0, HP - H), (0, 0)))                          # (HP, C)
    w2_aug = jnp.concatenate([w2_p, b2], axis=0)                       # (HP+1, C)
    w2_aug = jnp.pad(w2_aug, ((0, 0), (0, CP - C)))                    # (HP+1, CP)

    # All padding is zero, so the padded forward is numerically exact:
    # padded hidden lanes are relu(0+0)=0 and hit zero rows of w2.
    return {"embedding": emb_p, "w1_aug": w1_aug, "w2_aug": w2_aug}


def my_model_forward(words1, words2, packed, num_classes, *, block_b=256):
    """Mirrors my_model.forward(words1, words2) -> {'pred': logits}."""
    emb = packed["embedding"]                      # (VP, D)
    w1_aug = packed["w1_aug"]                      # (4D+1, HP)
    w2_aug = packed["w2_aug"]                      # (HP+1, CP)
    VP, D = emb.shape
    CP = w2_aug.shape[1]
    B, L = words1.shape

    # Batch tiling: one big tile for small/medium B (grid=1, no padding-heavy
    # last step); otherwise block_b rows per grid step.  Per-step overhead is
    # ~0.35 us and per-step VMEM is << 1 MiB even at TB=512, so bigger is better.
    if B <= 512:
        TB = _round_up(B, 8)
    else:
        TB = block_b
    Bp = _round_up(B, TB)
    if Bp != B:
        words1 = jnp.pad(words1, ((0, Bp - B), (0, 0)))
        words2 = jnp.pad(words2, ((0, Bp - B), (0, 0)))

    logits_padded = pl.pallas_call(
        dmso_kernel,
        out_shape=jax.ShapeDtypeStruct((Bp, CP), jnp.float32),
        grid=(Bp // TB,),
        in_specs=[
            pl.BlockSpec((TB, L), lambda i: (i, 0)),          # words1 tile
            pl.BlockSpec((TB, L), lambda i: (i, 0)),          # words2 tile
            pl.BlockSpec((VP, D), lambda i: (0, 0)),          # embedding (resident)
            pl.BlockSpec(w1_aug.shape, lambda i: (0, 0)),     # W1+b1    (resident)
            pl.BlockSpec(w2_aug.shape, lambda i: (0, 0)),     # W2+b2    (resident)
        ],
        out_specs=pl.BlockSpec((TB, CP), lambda i: (i, 0)),
        compiler_params=pltpu.CompilerParams(
            # Batch tiles are independent -> let v7x's 2 TensorCores split the
            # grid; harmless no-op on v5e/v6e.
            dimension_semantics=("parallel",),
        ),
    )(words1, words2, emb, w1_aug, w2_aug)

    return {"pred": logits_padded[:B, :num_classes]}


def init_params(key, vocab, embed_dim, hidden, num_classes):
    k_emb, k_w1, k_b1, k_w2, k_b2 = jax.random.split(key, 5)
    return {
        "embedding": 0.1 * jax.random.normal(k_emb, (vocab, embed_dim), jnp.float32),
        "w1": 0.05 * jax.random.normal(k_w1, (4 * embed_dim, hidden), jnp.float32),
        "b1": 0.01 * jax.random.normal(k_b1, (1, hidden), jnp.float32),
        "w2": 0.05 * jax.random.normal(k_w2, (hidden, num_classes), jnp.float32),
        "b2": 0.01 * jax.random.normal(k_b2, (1, num_classes), jnp.float32),
    }


def reference_forward(words1, words2, params):
    """Pure-JAX reference (same math, no Pallas) for a numerics check."""
    emb = params["embedding"]
    v1 = jnp.mean(jnp.take(emb, words1, axis=0), axis=1)
    v2 = jnp.mean(jnp.take(emb, words2, axis=0), axis=1)
    feat = jnp.concatenate([v1, v2, jnp.abs(v1 - v2), v1 * v2], axis=-1)
    h = jnp.maximum(feat @ params["w1"] + params["b1"], 0.0)
    return h @ params["w2"] + params["b2"]


if __name__ == "__main__":
    key = jax.random.PRNGKey(0)
    V, D, H, C = 100, 32, 200, 4      # vocab, embed dim, hidden_size=200, num_classes=4
    B, L = 2, 8                        # batch, sequence length

    k_params, k_i1, k_i2 = jax.random.split(key, 3)
    raw_params = init_params(k_params, V, D, H, C)
    packed = pack_params(raw_params)

    words1 = jax.random.randint(k_i1, (B, L), 0, V, dtype=jnp.int32)
    words2 = jax.random.randint(k_i2, (B, L), 0, V, dtype=jnp.int32)

    out = my_model_forward(words1, words2, packed, num_classes=C)
    pred = jax.block_until_ready(out["pred"])
    assert pred.shape == (B, C)

    ref = reference_forward(words1, words2, raw_params)
    assert jnp.allclose(pred, ref, atol=2e-3, rtol=2e-3), "mismatch vs reference"

    print("KERNEL_OK")
</pallas_src>

<mosaic_0001>
module attributes {stable_mosaic.version = 11 : i64} {
  func.func @dmso_kernel(%arg0: i32, %arg1: memref<8x8xi32, #tpu.memory_space<vmem>>, %arg2: memref<8x8xi32, #tpu.memory_space<vmem>>, %arg3: memref<128x32xf32, #tpu.memory_space<vmem>>, %arg4: memref<129x256xf32, #tpu.memory_space<vmem>>, %arg5: memref<257x128xf32, #tpu.memory_space<vmem>>, %arg6: memref<8x128xf32, #tpu.memory_space<vmem>>) attributes {dimension_semantics = [#tpu.dimension_semantics<parallel>], iteration_bounds = array<i64: 1>, scalar_prefetch = 0 : i64, scratch_operands = 0 : i64, tpu.core_type = #tpu.core_type<tc>, window_params = [{transform_indices = @transform_0, window_bounds = array<i64: 8, 8>}, {transform_indices = @transform_1, window_bounds = array<i64: 8, 8>}, {pipeline_mode = #tpu.pipeline_mode<synchronous>, transform_indices = @transform_2, window_bounds = array<i64: 128, 32>}, {pipeline_mode = #tpu.pipeline_mode<synchronous>, transform_indices = @transform_3, window_bounds = array<i64: 129, 256>}, {pipeline_mode = #tpu.pipeline_mode<synchronous>, transform_indices = @transform_4, window_bounds = array<i64: 257, 128>}, {transform_indices = @transform_5, window_bounds = array<i64: 8, 128>}]} {
    %c0 = arith.constant 0 : index
    %c0_0 = arith.constant 0 : index
    %0 = vector.load %arg1[%c0, %c0_0] : memref<8x8xi32, #tpu.memory_space<vmem>>, vector<8x8xi32>
    %c0_1 = arith.constant 0 : index
    %c0_2 = arith.constant 0 : index
    %1 = vector.load %arg2[%c0_1, %c0_2] : memref<8x8xi32, #tpu.memory_space<vmem>>, vector<8x8xi32>
    %2 = tpu.concatenate %0, %1 in 0 : vector<8x8xi32>, vector<8x8xi32> -> vector<16x8xi32>
    %3 = tpu.iota {dimensions = array<i32: 1>} : vector<1x128xi32>
    %cst = arith.constant 0.000000e+00 : f32
    %4 = vector.broadcast %cst : f32 to vector<16x128xf32>
    %5 = vector.extract_strided_slice %2 {offsets = [0, 0], sizes = [16, 1], strides = [1, 1]} : vector<16x8xi32> to vector<16x1xi32>
    %6 = vector.broadcast %5 : vector<16x1xi32> to vector<16x128xi32>
    %7 = vector.broadcast %3 : vector<1x128xi32> to vector<16x128xi32>
    %8 = arith.cmpi eq, %6, %7 : vector<16x128xi32>
    %9 = arith.extui %8 : vector<16x128xi1> to vector<16x128xi32>
    %10 = arith.sitofp %9 : vector<16x128xi32> to vector<16x128xf32>
    %11 = arith.addf %4, %10 : vector<16x128xf32>
    %12 = vector.extract_strided_slice %2 {offsets = [0, 1], sizes = [16, 1], strides = [1, 1]} : vector<16x8xi32> to vector<16x1xi32>
    %13 = vector.broadcast %12 : vector<16x1xi32> to vector<16x128xi32>
    %14 = vector.broadcast %3 : vector<1x128xi32> to vector<16x128xi32>
    %15 = arith.cmpi eq, %13, %14 : vector<16x128xi32>
    %16 = arith.extui %15 : vector<16x128xi1> to vector<16x128xi32>
    %17 = arith.sitofp %16 : vector<16x128xi32> to vector<16x128xf32>
    %18 = arith.addf %11, %17 : vector<16x128xf32>
    %19 = vector.extract_strided_slice %2 {offsets = [0, 2], sizes = [16, 1], strides = [1, 1]} : vector<16x8xi32> to vector<16x1xi32>
    %20 = vector.broadcast %19 : vector<16x1xi32> to vector<16x128xi32>
    %21 = vector.broadcast %3 : vector<1x128xi32> to vector<16x128xi32>
    %22 = arith.cmpi eq, %20, %21 : vector<16x128xi32>
    %23 = arith.extui %22 : vector<16x128xi1> to vector<16x128xi32>
    %24 = arith.sitofp %23 : vector<16x128xi32> to vector<16x128xf32>
    %25 = arith.addf %18, %24 : vector<16x128xf32>
    %26 = vector.extract_strided_slice %2 {offsets = [0, 3], sizes = [16, 1], strides = [1, 1]} : vector<16x8xi32> to vector<16x1xi32>
    %27 = vector.broadcast %26 : vector<16x1xi32> to vector<16x128xi32>
    %28 = vector.broadcast %3 : vector<1x128xi32> to vector<16x128xi32>
    %29 = arith.cmpi eq, %27, %28 : vector<16x128xi32>
    %30 = arith.extui %29 : vector<16x128xi1> to vector<16x128xi32>
    %31 = arith.sitofp %30 : vector<16x128xi32> to vector<16x128xf32>
    %32 = arith.addf %25, %31 : vector<16x128xf32>
    %33 = vector.extract_strided_slice %2 {offsets = [0, 4], sizes = [16, 1], strides = [1, 1]} : vector<16x8xi32> to vector<16x1xi32>
    %34 = vector.broadcast %33 : vector<16x1xi32> to vector<16x128xi32>
    %35 = vector.broadcast %3 : vector<1x128xi32> to vector<16x128xi32>
    %36 = arith.cmpi eq, %34, %35 : vector<16x128xi32>
    %37 = arith.extui %36 : vector<16x128xi1> to vector<16x128xi32>
    %38 = arith.sitofp %37 : vector<16x128xi32> to vector<16x128xf32>
    %39 = arith.addf %32, %38 : vector<16x128xf32>
    %40 = vector.extract_strided_slice %2 {offsets = [0, 5], sizes = [16, 1], strides = [1, 1]} : vector<16x8xi32> to vector<16x1xi32>
    %41 = vector.broadcast %40 : vector<16x1xi32> to vector<16x128xi32>
    %42 = vector.broadcast %3 : vector<1x128xi32> to vector<16x128xi32>
    %43 = arith.cmpi eq, %41, %42 : vector<16x128xi32>
    %44 = arith.extui %43 : vector<16x128xi1> to vector<16x128xi32>
    %45 = arith.sitofp %44 : vector<16x128xi32> to vector<16x128xf32>
    %46 = arith.addf %39, %45 : vector<16x128xf32>
    %47 = vector.extract_strided_slice %2 {offsets = [0, 6], sizes = [16, 1], strides = [1, 1]} : vector<16x8xi32> to vector<16x1xi32>
    %48 = vector.broadcast %47 : vector<16x1xi32> to vector<16x128xi32>
    %49 = vector.broadcast %3 : vector<1x128xi32> to vector<16x128xi32>
    %50 = arith.cmpi eq, %48, %49 : vector<16x128xi32>
    %51 = arith.extui %50 : vector<16x128xi1> to vector<16x128xi32>
    %52 = arith.sitofp %51 : vector<16x128xi32> to vector<16x128xf32>
    %53 = arith.addf %46, %52 : vector<16x128xf32>
    %54 = vector.extract_strided_slice %2 {offsets = [0, 7], sizes = [16, 1], strides = [1, 1]} : vector<16x8xi32> to vector<16x1xi32>
    %55 = vector.broadcast %54 : vector<16x1xi32> to vector<16x128xi32>
    %56 = vector.broadcast %3 : vector<1x128xi32> to vector<16x128xi32>
    %57 = arith.cmpi eq, %55, %56 : vector<16x128xi32>
    %58 = arith.extui %57 : vector<16x128xi1> to vector<16x128xi32>
    %59 = arith.sitofp %58 : vector<16x128xi32> to vector<16x128xf32>
    %60 = arith.addf %53, %59 : vector<16x128xf32>
    %c0_3 = arith.constant 0 : index
    %c0_4 = arith.constant 0 : index
    %61 = vector.load %arg3[%c0_3, %c0_4] : memref<128x32xf32, #tpu.memory_space<vmem>>, vector<128x32xf32>
    %cst_5 = arith.constant dense<0.000000e+00> : vector<16x32xf32>
    %62 = tpu.matmul %60, %61, %cst_5 {dimension_numbers = #tpu.dot_dimension_numbers<[1], [0], [0], [1], [0, 0, 1, 1], [], []>} : vector<16x128xf32>, vector<128x32xf32>, vector<16x32xf32> -> vector<16x32xf32>
    %cst_6 = arith.constant 1.250000e-01 : f32
    %63 = vector.broadcast %cst_6 : f32 to vector<16x32xf32>
    %64 = arith.mulf %62, %63 : vector<16x32xf32>
    %65 = vector.extract_strided_slice %64 {offsets = [0, 0], sizes = [8, 32], strides = [1, 1]} : vector<16x32xf32> to vector<8x32xf32>
    %66 = vector.extract_strided_slice %64 {offsets = [8, 0], sizes = [8, 32], strides = [1, 1]} : vector<16x32xf32> to vector<8x32xf32>
    %67 = arith.subf %65, %66 : vector<8x32xf32>
    %68 = math.absf %67 : vector<8x32xf32>
    %69 = arith.mulf %65, %66 : vector<8x32xf32>
    %70 = tpu.concatenate %65, %66, %68, %69 in 1 : vector<8x32xf32>, vector<8x32xf32>, vector<8x32xf32>, vector<8x32xf32> -> vector<8x128xf32>
    %c0_7 = arith.constant 0 : index
    %c0_8 = arith.constant 0 : index
    %71 = vector.load %arg4[%c0_7, %c0_8] : memref<129x256xf32, #tpu.memory_space<vmem>>, vector<128x256xf32>
    %cst_9 = arith.constant dense<0.000000e+00> : vector<8x256xf32>
    %72 = tpu.matmul %70, %71, %cst_9 {dimension_numbers = #tpu.dot_dimension_numbers<[1], [0], [0], [1], [0, 0, 1, 1], [], []>} : vector<8x128xf32>, vector<128x256xf32>, vector<8x256xf32> -> vector<8x256xf32>
    %c128 = arith.constant 128 : index
    %c0_10 = arith.constant 0 : index
    %73 = vector.load %arg4[%c128, %c0_10] : memref<129x256xf32, #tpu.memory_space<vmem>>, vector<1x256xf32>
    %74 = vector.broadcast %73 : vector<1x256xf32> to vector<8x256xf32>
    %75 = arith.addf %72, %74 : vector<8x256xf32>
    %cst_11 = arith.constant 0.000000e+00 : f32
    %76 = vector.broadcast %cst_11 : f32 to vector<8x256xf32>
    %77 = arith.maximumf %75, %76 : vector<8x256xf32>
    %c0_12 = arith.constant 0 : index
    %c0_13 = arith.constant 0 : index
    %78 = vector.load %arg5[%c0_12, %c0_13] : memref<257x128xf32, #tpu.memory_space<vmem>>, vector<256x128xf32>
    %cst_14 = arith.constant dense<0.000000e+00> : vector<8x128xf32>
    %79 = tpu.matmul %77, %78, %cst_14 {dimension_numbers = #tpu.dot_dimension_numbers<[1], [0], [0], [1], [0, 0, 1, 1], [], []>} : vector<8x256xf32>, vector<256x128xf32>, vector<8x128xf32> -> vector<8x128xf32>
    %c256 = arith.constant 256 : index
    %c0_15 = arith.constant 0 : index
    %80 = vector.load %arg5[%c256, %c0_15] : memref<257x128xf32, #tpu.memory_space<vmem>>, vector<1x128xf32>
    %81 = vector.broadcast %80 : vector<1x128xf32> to vector<8x128xf32>
    %82 = arith.addf %79, %81 : vector<8x128xf32>
    %c0_16 = arith.constant 0 : index
    %c0_17 = arith.constant 0 : index
    %83 = vector.load %arg6[%c0_16, %c0_17] : memref<8x128xf32, #tpu.memory_space<vmem>>, vector<8x128xf32>
    tpu.vector_store %arg6[%c0_16, %c0_17], %82 {strides = array<i32>} : memref<8x128xf32, #tpu.memory_space<vmem>>, vector<8x128xf32>,
    return
  }
  func.func @transform_0(%arg0: i32) -> (i32, i32) {
    %c0_i32 = arith.constant 0 : i32
    %c0_i32_0 = arith.constant 0 : i32
    return %arg0, %c0_i32 : i32, i32
  }
  func.func @transform_1(%arg0: i32) -> (i32, i32) {
    %c0_i32 = arith.constant 0 : i32
    %c0_i32_0 = arith.constant 0 : i32
    return %arg0, %c0_i32 : i32, i32
  }
  func.func @transform_2(%arg0: i32) -> (i32, i32) {
    %c0_i32 = arith.constant 0 : i32
    %c0_i32_0 = arith.constant 0 : i32
    %c0_i32_1 = arith.constant 0 : i32
    return %c0_i32, %c0_i32_0 : i32, i32
  }
  func.func @transform_3(%arg0: i32) -> (i32, i32) {
    %c0_i32 = arith.constant 0 : i32
    %c0_i32_0 = arith.constant 0 : i32
    %c0_i32_1 = arith.constant 0 : i32
    return %c0_i32, %c0_i32_0 : i32, i32
  }
  func.func @transform_4(%arg0: i32) -> (i32, i32) {
    %c0_i32 = arith.constant 0 : i32
    %c0_i32_0 = arith.constant 0 : i32
    %c0_i32_1 = arith.constant 0 : i32
    return %c0_i32, %c0_i32_0 : i32, i32
  }
  func.func @transform_5(%arg0: i32) -> (i32, i32) {
    %c0_i32 = arith.constant 0 : i32
    %c0_i32_0 = arith.constant 0 : i32
    return %arg0, %c0_i32 : i32, i32
  }
}

</mosaic_0001>

<bundles_post_ra>
// kernel: tpu_custom_call.1
= control target key start
LH: loop header
LB: loop body
LE: loop exit
PB: predicated region body
PF: predicated region fallthrough
CT: control target
= control target key end

     0   :  { %10 = vsyncpa [#allocation3], 0  ;;  %s653_s0 = inlined_call_operand.vmem [shape: s32[8,8], index: 0, kind: input, shape index: {}]   ;;  %s654_s1 = inlined_call_operand.vmem [shape: s32[8,8], index: 1, kind: input, shape index: {}]   ;;  %s655_s2 = inlined_call_operand.vmem [shape: f32[128,32], index: 2, kind: input, shape index: {}]   ;;  %s656_s3 = inlined_call_operand.hbm [shape: f32[129,256], index: 3, kind: input, shape index: {}]   ;;  %s657_s4 = inlined_call_operand.hbm [shape: f32[257,128], index: 4, kind: input, shape index: {}]   ;;  %s658_s5 = inlined_call_operand.hbm [shape: f32[8,128], index: 5, kind: output, shape index: {}]  }
   0x1   :  { %11 = vsyncpa [#allocation6], 0 }
   0x2   :  { %12 = vsyncpa [#allocation4], 0  ;;  %s23_s20 = sshll.u32 %s656_s3, 4  ;;  %s536_s21 = smov [#allocation2]   ;;  %s24_s20 = int_to_ptr.hbm [resolvable:$true] %s23_s20 }
   0x3   :  { %s25_s22 = sshll.u32 %s536_s21, 4  ;;  %s36_s25 = sshll.u32 %s657_s4, 4  ;;  %s26_s22 = int_to_ptr.vmem [resolvable:$true] %s25_s22  ;;  %s37_s25 = int_to_ptr.hbm [resolvable:$true] %s36_s25 }
   0x4   :  { %s537_s26 = smov 256   ;;  %s538_s27 = smov 16  }
   0x5   :  { %31 = dma.hbm_to_vmem [thread:$0]  %s24_s20, 4352, %s26_s22, [#allocation3], %s537_s26, %s537_s26, %s538_s27  }
   0x6   :  { %s539_s28 = smov [#allocation5]   ;;  %s540_s30 = smov 128  }
   0x7   :  { %s38_s29 = sshll.u32 %s539_s28, 4  ;;  %s541_s6 = smov 8   ;;  %s39_s29 = int_to_ptr.vmem [resolvable:$true] %s38_s29 }
   0x8   :  { %44 = dma.hbm_to_vmem [thread:$0]  %s37_s25, 4224, %s39_s29, [#allocation6], %s540_s30, %s540_s30, %s541_s6  }
   0x9   :  { %530 = dma.done.wait [#allocation3], 4352  }
   0xa   :  { %531 = vsyncadd [#allocation3], 4294962944 }
   0xb   :  { %532 = dma.done.wait [#allocation6], 4224  }
   0xc   :  { %533 = vsyncadd [#allocation6], 4294963072  ;;  %v542_v0 = vmov 2   ;;  %v543_v1 = vmov 0   ;;  %v544_v2 = vmov 4   ;;  %v53_v3 = vld [vmem:[%s653_s0] sm:$0xff]  ;;  %v55_v30 = vlaneseq }
   0xd   :  { %442 = vset.pattern.permute.xlu1 %v542_v0  ;;  %440 = vset.pattern.permute.xlu0 %v543_v1  ;;  %v545_v4 = vmov 3   ;;  %v546_v5 = vmov 1   ;;  %v54_v6 = vld [vmem:[%s654_s1] sm:$0xff]  ;;  %v547_v7 = vmov 5   ;;  %v548_v8 = vmov 6   ;;  %v184_v10 = vld [vmem:[%s655_s2 + $0x78] sm:$0xff] }
   0xe   :  { %444 = vset.pattern.permute.xlu2 %v544_v2  ;;  %86 = vperm.xlu1 %442, %v53_v3   ;;  %v549_v9 = vmov 7   ;;  %v183_v11 = vld [vmem:[%s655_s2 + $0x70] sm:$0xff]  ;;  %v182_v12 = vld [vmem:[%s655_s2 + $0x68] sm:$0xff]  ;;  %v181_v13 = vld [vmem:[%s655_s2 + $0x60] sm:$0xff]  ;;  %v56_v33 = vand.u32 127, %v55_v30  ;;  %v550_v35 = vmov 0.0  }
   0xf   :  { %58 = vperm.xlu0 %440, %v53_v3   ;;  %114 = vperm.xlu2 %444, %v53_v3   ;;  %v180_v14 = vld [vmem:[%s655_s2 + $0x58] sm:$0xff]  ;;  %v179_v15 = vld [vmem:[%s655_s2 + $0x50] sm:$0xff]  ;;  %v178_v16 = vld [vmem:[%s655_s2 + $0x48] sm:$0xff]  ;;  %s552_s10 = smov 96   ;;  %s553_s11 = smov 64  }
  0x10   :  { %185 = vmatpush.msra.mxu0 %v184_v10  ;;  %v177_v17 = vld [vmem:[%s655_s2 + $0x40] sm:$0xff]  ;;  %v176_v19 = vld [vmem:[%s655_s2 + $0x38] sm:$0xff]  ;;  %v175_v20 = vld [vmem:[%s655_s2 + $0x30] sm:$0xff]  ;;  %s554_s12 = smov [#allocation7]   ;;  %s394_s16 = sshll.u32 %s658_s5, 4  ;;  %s395_s16 = int_to_ptr.hbm [resolvable:$true] %s394_s16 }
  0x11   :  { %v174_v21 = vld [vmem:[%s655_s2 + $0x28] sm:$0xff]  ;;  %v173_v22 = vld [vmem:[%s655_s2 + $0x20] sm:$0xff]  ;;  %v172_v23 = vld [vmem:[%s655_s2 + $0x18] sm:$0xff]  ;;  %s392_s13 = sshll.u32 %s554_s12, 4  ;;  %s393_s13 = int_to_ptr.vmem [resolvable:$true] %s392_s13 }
  0x12   :  { %186 = vmatpush.msra.mxu0 %v183_v11  ;;  %v171_v26 = vld [vmem:[%s655_s2 + $0x10] sm:$0xff]  ;;  %v170_v28 = vld [vmem:[%s655_s2 + $0x8] sm:$0xff]  ;;  %v169_v29 = vld [vmem:[%s655_s2] sm:$0xff]  ;;  %s551_s2 = smov 32  }
  0x13   :  { %v261_v11 = vld [vmem:[#allocation2 + $0xf0] sm:$0xff] }
  0x14   :  { %187 = vmatpush.msra.mxu0 %v182_v12  ;;  %v262_v12 = vld [vmem:[#allocation2 + $0xf8] sm:$0xff]  ;;  %270 = vmatpush.msra.mxu1 %v261_v11  ;;  %v249_v30 = vld [vmem:[#allocation2 + $0x90] sm:$0xff] }
  0x15   :  { %290 = vmatpush.msra.mxu2 %v262_v12 }
  0x16   :  { %443 = vset.pattern.permute.xlu1 %v545_v4  ;;  %188 = vmatpush.msra.mxu0 %v181_v13  ;;  %v259_v13 = vld [vmem:[#allocation2 + $0xe0] sm:$0xff] }
  0x17   :  { %441 = vset.pattern.permute.xlu0 %v546_v5  ;;  %100 = vperm.xlu1 %443, %v53_v3  }
  0x18   :  { %72 = vperm.xlu0 %441, %v53_v3   ;;  %445 = vset.pattern.permute.xlu2 %v543_v1 }
  0x19   :  { %61 = vperm.xlu2 %445, %v54_v6   ;;  %189 = vmatpush.msra.mxu0 %v180_v14  ;;  %v260_v14 = vld [vmem:[#allocation2 + $0xe8] sm:$0xff] }
  0x1a   :  { %271 = vmatpush.msra.mxu1 %v259_v13  ;;  %291 = vmatpush.msra.mxu2 %v260_v14 }
  0x1b   :  { %190 = vmatpush.msra.mxu0 %v179_v15  ;;  %v257_v15 = vld [vmem:[#allocation2 + $0xd0] sm:$0xff] }
  0x1c   :  { %272 = vmatpush.msra.mxu1 %v257_v15  ;;  %v314_v15 = vld [vmem:[#allocation5 + $0x10] sm:$0xff] }
  0x1d   :  { %191 = vmatpush.msra.mxu0 %v178_v16  ;;  %v258_v16 = vld [vmem:[#allocation2 + $0xd8] sm:$0xff] }
  0x1e   :  { %292 = vmatpush.msra.mxu2 %v258_v16  ;;  %v333_v16 = vld [vmem:[#allocation5 + $0xa8] sm:$0xff] }
  0x1f   :  { %446 = vset.pattern.permute.xlu1 %v546_v5  ;;  %192 = vmatpush.msra.mxu0 %v177_v17  ;;  %v255_v17 = vld [vmem:[#allocation2 + $0xc0] sm:$0xff] }
  0x20   :  { %448 = vset.pattern.permute.xlu0 %v542_v0  ;;  %75 = vperm.xlu1 %446, %v54_v6  }
  0x21   :  { %89 = vperm.xlu0 %448, %v54_v6   ;;  %447 = vset.pattern.permute.xlu2 %v547_v7 }
  0x22   :  { %128 = vperm.xlu2 %447, %v53_v3   ;;  %193 = vmatpush.msra.mxu0 %v176_v19 }
  0x23   :  { %273 = vmatpush.msra.mxu1 %v255_v17  ;;  %v313_v17 = vld [vmem:[#allocation5 + $0x8] sm:$0xff] }
  0x24   :  { %194 = vmatpush.msra.mxu0 %v175_v20 }
  0x26   :  { %195 = vmatpush.msra.mxu0 %v174_v21 }
  0x28   :  { %449 = vset.pattern.permute.xlu1 %v548_v8  ;;  %196 = vmatpush.msra.mxu0 %v173_v22 }
  0x29   :  { %453 = vset.pattern.permute.xlu0 %v547_v7  ;;  %142 = vperm.xlu1 %449, %v53_v3  }
  0x2a   :  { %131 = vperm.xlu0 %453, %v54_v6   ;;  %450 = vset.pattern.permute.xlu2 %v545_v4 }
  0x2b   :  { %103 = vperm.xlu2 %450, %v54_v6   ;;  %197 = vmatpush.msra.mxu0 %v172_v23 }
  0x2d   :  { %198 = vmatpush.msra.mxu0 %v171_v26  ;;  %v253_v26 = vld [vmem:[#allocation2 + $0xb0] sm:$0xff] }
  0x2e   :  { %274 = vmatpush.msra.mxu1 %v253_v26 }
  0x2f   :  { %199 = vmatpush.msra.mxu0 %v170_v28  ;;  %v251_v28 = vld [vmem:[#allocation2 + $0xa0] sm:$0xff] }
  0x30   :  { %275 = vmatpush.msra.mxu1 %v251_v28 }
  0x31   :  { %451 = vset.pattern.permute.xlu1 %v549_v9  ;;  %200 = vmatpush.msra.mxu0 %v169_v29  ;;  %v252_v29 = vld [vmem:[#allocation2 + $0xa8] sm:$0xff] }
  0x32   :  { %456 = vset.pattern.permute.xlu0 %v549_v9  ;;  %156 = vperm.xlu1 %451, %v53_v3  }
  0x33   :  { %452 = vset.pattern.permute.xlu2 %v544_v2  ;;  %276 = vmatpush.msra.mxu1 %v249_v30 }
  0x34   :  { %117 = vperm.xlu2 %452, %v54_v6  }
  0x3a   :  { %454 = vset.pattern.permute.xlu1 %v548_v8 }
  0x3b   :  { %145 = vperm.xlu1 %454, %v54_v6  }
  0x3c   :  { %455 = vset.pattern.permute.xlu2 %v549_v9 }
  0x3d   :  { %159 = vperm.xlu2 %455, %v54_v6  }
  0x69   :  { %v115_v18 = vpop.permute.xlu2 %114 }
  0x6a   :  { %vm119_vm6 = vcmp.eq.s32.totalorder %v115_v18, %v56_v33  ;;  %v256_v18 = vld [vmem:[#allocation2 + $0xc8] sm:$0xff] }
  0x6b   :  { %v413_v49 = vsel %vm119_vm6, 1.0, %v550_v35  ;;  %293 = vmatpush.msra.mxu2 %v256_v18  ;;  %v332_v18 = vld [vmem:[#allocation5 + $0xa0] sm:$0xff] }
  0x73   :  { %v62_v27 = vpop.permute.xlu2 %61 }
  0x74   :  { %vm64_vm5 = vcmp.eq.s32.totalorder %v62_v27, %v56_v33  ;;  %v254_v27 = vld [vmem:[#allocation2 + $0xb8] sm:$0xff] }
  0x75   :  { %v406_v48 = vsel %vm64_vm5, 1.0, %v550_v35  ;;  %294 = vmatpush.msra.mxu2 %v254_v27 }
  0x77   :  { %295 = vmatpush.msra.mxu2 %v252_v29 }
  0x7c   :  { %v129_v34 = vpop.permute.xlu2 %128 }
  0x7d   :  { %vm133_vm8 = vcmp.eq.s32.totalorder %v129_v34, %v56_v33  ;;  %v245_v34 = vld [vmem:[#allocation2 + $0x70] sm:$0xff] }
  0x7e   :  { %v415_v53 = vsel %vm133_vm8, 1.0, %v550_v35 }
  0x80   :  { %v87_v24 = vpop.permute.xlu1 %86 }
  0x81   :  { %v59_v25 = vpop.permute.xlu0 %58  ;;  %vm91_vm2 = vcmp.eq.s32.totalorder %v87_v24, %v56_v33 }
  0x82   :  { %vm63_vm0 = vcmp.eq.s32.totalorder %v59_v25, %v56_v33  ;;  %v409_v40 = vsel %vm91_vm2, 1.0, %v550_v35  ;;  %vm229_vm2 = vcmask 785408  }
  0x83   :  { %v405_v36 = vsel %vm63_vm0, 1.0, %v550_v35  ;;  %vm225_vm0 = vcmask 261120  }
  0x85   :  { %v104_v42 = vpop.permute.xlu2 %103 }
  0x86   :  { %vm106_vm10 = vcmp.eq.s32.totalorder %v104_v42, %v56_v33  ;;  %v237_v42 = vld [vmem:[#allocation2 + $0x30] sm:$0xff] }
  0x87   :  { %v412_v57 = vsel %vm106_vm10, 1.0, %v550_v35 }
  0x89   :  { %v101_v31 = vpop.permute.xlu1 %100 }
  0x8a   :  { %v73_v32 = vpop.permute.xlu0 %72  ;;  %vm105_vm3 = vcmp.eq.s32.totalorder %v101_v31, %v56_v33  ;;  %v250_v31 = vld [vmem:[#allocation2 + $0x98] sm:$0xff] }
  0x8b   :  { %vm77_vm1 = vcmp.eq.s32.totalorder %v73_v32, %v56_v33  ;;  %v411_v44 = vsel %vm105_vm3, 1.0, %v550_v35  ;;  %v247_v32 = vld [vmem:[#allocation2 + $0x80] sm:$0xff]  ;;  %296 = vmatpush.msra.mxu2 %v250_v31 }
  0x8c   :  { %v407_v37 = vsel %vm77_vm1, 1.0, %v550_v35  ;;  %277 = vmatpush.msra.mxu1 %v247_v32  ;;  %vm227_vm1 = vcmask 523264  }
  0x8d   :  { %v83_v39 = vadd.f32 %v407_v37, %v405_v36  ;;  %v243_v36 = vld [vmem:[#allocation2 + $0x60] sm:$0xff]  ;;  %v244_v37 = vld [vmem:[#allocation2 + $0x68] sm:$0xff] }
  0x8e   :  { %v118_v54 = vpop.permute.xlu2 %117  ;;  %278 = vmatpush.msra.mxu1 %v245_v34 }
  0x8f   :  { %v97_v41 = vadd.f32 %v409_v40, %v83_v39  ;;  %vm120_vm11 = vcmp.eq.s32.totalorder %v118_v54, %v56_v33  ;;  %v242_v39 = vld [vmem:[#allocation2 + $0x58] sm:$0xff]  ;;  %v239_v40 = vld [vmem:[#allocation2 + $0x40] sm:$0xff] }
  0x90   :  { %v414_v0 = vsel %vm120_vm11, 1.0, %v550_v35  ;;  %279 = vmatpush.msra.mxu1 %v243_v36  ;;  %v342_v54 = vld [vmem:[#allocation5 + $0xf0] sm:$0xff] }
  0x91   :  { %v111_v45 = vadd.f32 %v411_v44, %v97_v41  ;;  %v240_v41 = vld [vmem:[#allocation2 + $0x48] sm:$0xff]  ;;  %v235_v44 = vld [vmem:[#allocation2 + $0x20] sm:$0xff] }
  0x92   :  { %v76_v38 = vpop.permute.xlu1 %75 }
  0x93   :  { %vm78_vm4 = vcmp.eq.s32.totalorder %v76_v38, %v56_v33  ;;  %v90_v43 = vpop.permute.xlu0 %89  ;;  %v125_v52 = vadd.f32 %v413_v49, %v111_v45  ;;  %v241_v38 = vld [vmem:[#allocation2 + $0x50] sm:$0xff]  ;;  %v236_v45 = vld [vmem:[#allocation2 + $0x28] sm:$0xff] }
  0x94   :  { %v408_v46 = vsel %vm78_vm4, 1.0, %v550_v35  ;;  %vm92_vm7 = vcmp.eq.s32.totalorder %v90_v43, %v56_v33  ;;  %280 = vmatpush.msra.mxu1 %v241_v38  ;;  %v238_v43 = vld [vmem:[#allocation2 + $0x38] sm:$0xff]  ;;  %v232_v49 = vld [vmem:[#allocation2 + $0x8] sm:$0xff] }
  0x95   :  { %v84_v50 = vadd.f32 %v408_v46, %v406_v48  ;;  %v410_v51 = vsel %vm92_vm7, 1.0, %v550_v35  ;;  %v139_v58 = vadd.f32 %v415_v53, %v125_v52  ;;  %v233_v46 = vld [vmem:[#allocation2 + $0x10] sm:$0xff]  ;;  %v231_v48 = vld [vmem:[#allocation2] sm:$0xff]  ;;  %v343_v52 = vld [vmem:[#allocation5 + $0xf8] sm:$0xff] }
  0x96   :  { %281 = vmatpush.msra.mxu1 %v239_v40  ;;  %v325_v53 = vld [vmem:[#allocation5 + $0x68] sm:$0xff]  ;;  %366 = vmatpush.msrb.mxu0 %v343_v52 }
  0x97   :  { %v98_v55 = vadd.f32 %v410_v51, %v84_v50  ;;  %v160_v2 = vpop.permute.xlu2 %159  ;;  %v327_v50 = vld [vmem:[#allocation5 + $0x78] sm:$0xff]  ;;  %v326_v51 = vld [vmem:[#allocation5 + $0x70] sm:$0xff] }
  0x98   :  { %vm162_vm14 = vcmp.eq.s32.totalorder %v160_v2, %v56_v33  ;;  %282 = vmatpush.msra.mxu1 %v237_v42  ;;  %346 = vmatpush.msra.mxu3 %v327_v50  ;;  %v319_v2 = vld [vmem:[#allocation5 + $0x38] sm:$0xff] }
  0x99   :  { %v112_v62 = vadd.f32 %v412_v57, %v98_v55  ;;  %v420_v8 = vsel %vm162_vm14, 1.0, %v550_v35  ;;  %v341_v55 = vld [vmem:[#allocation5 + $0xe8] sm:$0xff]  ;;  %367 = vmatpush.msrb.mxu0 %v342_v54  ;;  %v340_v57 = vld [vmem:[#allocation5 + $0xe0] sm:$0xff] }
  0x9a   :  { %283 = vmatpush.msra.mxu1 %v235_v44  ;;  %347 = vmatpush.msra.mxu3 %v326_v51 }
  0x9b   :  { %v143_v47 = vpop.permute.xlu1 %142  ;;  %v126_v3 = vadd.f32 %v414_v0, %v112_v62  ;;  %368 = vmatpush.msrb.mxu0 %v341_v55  ;;  %v321_v62 = vld [vmem:[#allocation5 + $0x48] sm:$0xff]  ;;  %v320_v0 = vld [vmem:[#allocation5 + $0x40] sm:$0xff] }
  0x9c   :  { %vm147_vm9 = vcmp.eq.s32.totalorder %v143_v47, %v56_v33  ;;  %v132_v61 = vpop.permute.xlu0 %131  ;;  %v234_v47 = vld [vmem:[#allocation2 + $0x18] sm:$0xff]  ;;  %284 = vmatpush.msra.mxu1 %v233_v46  ;;  %348 = vmatpush.msra.mxu3 %v325_v53 }
  0x9d   :  { %v417_v56 = vsel %vm147_vm9, 1.0, %v550_v35  ;;  %vm134_vm13 = vcmp.eq.s32.totalorder %v132_v61, %v56_v33  ;;  %369 = vmatpush.msrb.mxu0 %v340_v57  ;;  %v338_v61 = vld [vmem:[#allocation5 + $0xd0] sm:$0xff] }
  0x9e   :  { %v153_v60 = vadd.f32 %v417_v56, %v139_v58  ;;  %v416_v4 = vsel %vm134_vm13, 1.0, %v550_v35  ;;  %285 = vmatpush.msra.mxu1 %v231_v48  ;;  %v324_v56 = vld [vmem:[#allocation5 + $0x60] sm:$0xff]  ;;  %v323_v58 = vld [vmem:[#allocation5 + $0x58] sm:$0xff] }
  0x9f   :  { %v140_v6 = vadd.f32 %v416_v4, %v126_v3  ;;  %349 = vmatpush.msra.mxu3 %v324_v56  ;;  %v335_v3 = vld [vmem:[#allocation5 + $0xb8] sm:$0xff]  ;;  %v318_v4 = vld [vmem:[#allocation5 + $0x30] sm:$0xff] }
  0xa1   :  { %350 = vmatpush.msra.mxu3 %v323_v58 }
  0xa4   :  { %v157_v59 = vpop.permute.xlu1 %156 }
  0xa5   :  { %vm161_vm12 = vcmp.eq.s32.totalorder %v157_v59, %v56_v33  ;;  %v339_v59 = vld [vmem:[#allocation5 + $0xd8] sm:$0xff] }
  0xa6   :  { %v419_v63 = vsel %vm161_vm12, 1.0, %v550_v35  ;;  %370 = vmatpush.msrb.mxu0 %v339_v59 }
  0xa7   :  { %v167_v1 = vadd.f32 %v419_v63, %v153_v60  ;;  %v322_v60 = vld [vmem:[#allocation5 + $0x50] sm:$0xff]  ;;  %v337_v63 = vld [vmem:[#allocation5 + $0xc8] sm:$0xff] }
  0xa8   :  { %351 = vmatpush.msra.mxu3 %v322_v60  ;;  %371 = vmatpush.msrb.mxu0 %v338_v61 }
  0xa9   :  { %201 = vmatmul.f32.vlgmr.msra.gmra.mxu0 %v167_v1  ;;  %v336_v1 = vld [vmem:[#allocation5 + $0xc0] sm:$0xff] }
  0xaa   :  { %352 = vmatpush.msra.mxu3 %v321_v62  ;;  %372 = vmatpush.msrb.mxu0 %v337_v63 }
  0xac   :  { %353 = vmatpush.msra.mxu3 %v320_v0  ;;  %373 = vmatpush.msrb.mxu0 %v336_v1 }
  0xad   :  { %v146_v5 = vpop.permute.xlu1 %145 }
  0xae   :  { %vm148_vm15 = vcmp.eq.s32.totalorder %v146_v5, %v56_v33  ;;  %v248_v33 = vld [vmem:[#allocation2 + $0x88] sm:$0xff]  ;;  %354 = vmatpush.msra.mxu3 %v319_v2  ;;  %v334_v5 = vld [vmem:[#allocation5 + $0xb0] sm:$0xff]  ;;  %374 = vmatpush.msrb.mxu0 %v335_v3 }
  0xaf   :  { %v418_v7 = vsel %vm148_vm15, 1.0, %v550_v35  ;;  %v246_v35 = vld [vmem:[#allocation2 + $0x78] sm:$0xff]  ;;  %297 = vmatpush.msra.mxu2 %v248_v33  ;;  %v457_v33 = vld [vmem:[#allocation5 + $0x100] ss:$0 sm:$0xff] }
  0xb0   :  { %v154_v9 = vadd.f32 %v418_v7, %v140_v6  ;;  %v317_v6 = vld [vmem:[#allocation5 + $0x28] sm:$0xff]  ;;  %355 = vmatpush.msra.mxu3 %v318_v4  ;;  %v316_v7 = vld [vmem:[#allocation5 + $0x20] sm:$0xff]  ;;  %375 = vmatpush.msrb.mxu0 %v334_v5 }
  0xb1   :  { %298 = vmatpush.msra.mxu2 %v246_v35 }
  0xb2   :  { %v168_v10 = vadd.f32 %v420_v8, %v154_v9  ;;  %356 = vmatpush.msra.mxu3 %v317_v6  ;;  %v315_v8 = vld [vmem:[#allocation5 + $0x18] sm:$0xff]  ;;  %376 = vmatpush.msrb.mxu0 %v333_v16 }
  0xb3   :  { %299 = vmatpush.msra.mxu2 %v244_v37 }
  0xb4   :  { %204 = vmatmul.f32.gmra.mxu0 %v168_v10  ;;  %357 = vmatpush.msra.mxu3 %v316_v7 }
  0xb5   :  { %300 = vmatpush.msra.mxu2 %v242_v39  ;;  %377 = vmatpush.msrb.mxu0 %v332_v18 }
  0xb6   :  { %358 = vmatpush.msra.mxu3 %v315_v8 }
  0xb7   :  { %301 = vmatpush.msra.mxu2 %v240_v41 }
  0xb8   :  { %359 = vmatpush.msra.mxu3 %v314_v15 }
  0xb9   :  { %302 = vmatpush.msra.mxu2 %v238_v43 }
  0xba   :  { %360 = vmatpush.msra.mxu3 %v313_v17 }
  0xbb   :  { %303 = vmatpush.msra.mxu2 %v236_v45 }
  0xbd   :  { %304 = vmatpush.msra.mxu2 %v234_v47 }
  0xbf   :  { %305 = vmatpush.msra.mxu2 %v232_v49 }
 0x126   :  { %v202_v19 = vpop.f32.mrf.mxu0 }
 0x127   :  { %v645_v21 = vmul.f32 0.125, %v202_v19  ;;  %v312_v19 = vld [vmem:[#allocation5] sm:$0xff] }
 0x128   :  { %361 = vmatpush.msra.mxu3 %v312_v19 }
 0x131   :  { %v205_v20 = vpop.f32.mrf.mxu0 }
 0x132   :  { %v209_v22 = vmul.f32 0.125, %v205_v20  ;;  %v331_v20 = vld [vmem:[#allocation5 + $0x98] sm:$0xff] }
 0x133   :  { %378 = vmatpush.msrb.mxu0 %v331_v20 }
 0x134   :  { %214 = vrot.lane.b32.xlu1 %v209_v22, %s551_s2  ;;  %v212_v23 = vmul.f32 %v209_v22, %v645_v21  ;;  %v210_v24 = vsub.f32 %v645_v21, %v209_v22  ;;  %v330_v22 = vld [vmem:[#allocation5 + $0x90] sm:$0xff] }
 0x135   :  { %379 = vmatpush.msrb.mxu0 %v330_v22 }
 0x136   :  { %222 = vrot.lane.b32.xlu0 %v212_v23, %s552_s10  ;;  %v211_v25 = vand.u32 2147483647, %v210_v24  ;;  %v328_v23 = vld [vmem:[#allocation5 + $0x80] sm:$0xff]  ;;  %v264_v24 = vld [vmem:[#allocation2 + $0x100] ss:$8 sm:$0x3] }
 0x137   :  { %v267_v29 = vperm.slane %v264_v24, 1 }
 0x138   :  { %218 = vrot.lane.b32.xlu2 %v211_v25, %s553_s11  ;;  %v266_v25 = vperm.slane %v264_v24, 0 }
 0x192   :  { %v219_v10 = vpop.permute.xlu2 %218 }
 0x1a6   :  { %v215_v9 = vpop.permute.xlu1 %214 }
 0x1a7   :  { %v226_v11 = vsel %vm225_vm0, %v645_v21, %v215_v9  ;;  %v329_v21 = vld [vmem:[#allocation5 + $0x88] sm:$0xff] }
 0x1a8   :  { %v223_v12 = vpop.permute.xlu0 %222  ;;  %v228_v13 = vsel %vm227_vm1, %v226_v11, %v219_v10  ;;  %380 = vmatpush.msrb.mxu0 %v329_v21 }
 0x1a9   :  { %v230_v14 = vsel %vm229_vm2, %v228_v13, %v223_v12 }
 0x1aa   :  { %286 = vmatmul.f32.vlgmr.msra.gmra.mxu1 %v230_v14  ;;  %306 = vmatmul.f32.vlgmr.msra.gmra.mxu2 %v230_v14 }
 0x1ab   :  { %381 = vmatpush.msrb.mxu0 %v328_v23 }
 0x227   :  { %v287_v26 = vpop.f32.mrf.mxu1 }
 0x228   :  { %v288_v27 = vadd.f32 %v287_v26, %v266_v25 }
 0x22a   :  { %v310_v28 = vmax.f32 %v288_v27, 0.0 }
 0x22c   :  { %362 = vmatmul.f32.vlgmr.msra.gmra.mxu3 %v310_v28 }
 0x22d   :  { %v307_v30 = vpop.f32.mrf.mxu2 }
 0x22e   :  { %v308_v31 = vadd.f32 %v307_v30, %v267_v29 }
 0x230   :  { %v311_v32 = vmax.f32 %v308_v31, 0.0 }
 0x232   :  { %382 = vmatmul.f32.vlgmr.msrb.gmra.mxu0 %v311_v32 }
 0x2af   :  { %v363_v34 = vpop.f32.mrf.mxu3  ;;  %v383_v36 = vpop.f32.mrf.mxu0 }
 0x2b0   :  { %v364_v35 = vadd.f32 %v457_v33, %v363_v34 }
 0x2b2   :  { %v384_v37 = vadd.f32 %v383_v36, %v364_v35 }
 0x2b4   :  { %386 = vst [vmem:[#allocation7] sm:$0xff] %v384_v37 }
 0x2b5   :  { %397 = dma.vmem_to_hbm [thread:$0]  %s393_s13, 128, %s395_s16, [#allocation4]  }
 0x2b6   :  { %534 = dma.done.wait [#allocation4], 128  }
 0x2b7   :  { %535 = vsyncadd [#allocation4], 4294967168 }
 0x2b8   :  { %402 = vsyncpa [#allocation3], 1 }
 0x2b9   :  { %403 = vsyncpa [#allocation6], 1 }
 0x2ba   :  { %404 = vsyncpa [#allocation4], 1 }

</bundles_post_ra>
